<compile_context>
chip_gen: v6e
topology: v6e:2x2x1
jax: 0.10.0
libtpu: 0.0.40
codegen_flags: <defaults>
</compile_context>

<pallas_src>
import functools
import math

import jax
import jax.numpy as jnp
from jax.experimental import pallas as pl
from jax.experimental.pallas import tpu as pltpu


def _round_up(x, m):
    return ((x + m - 1) // m) * m


def _pick_tile_n(n, d):
    """Rows per block: ~2 MiB of x per block, >= ~4 grid steps when possible."""
    target_bytes = 2 * 1024 * 1024
    tn = (target_bytes // (4 * max(d, 8))) // 128 * 128
    tn = max(tn, 128)
    # Keep >= ~4 grid steps so megacore sharding and pipelining engage.
    tn = min(tn, max(128, _round_up(pl.cdiv(n, 4), 128)))
    if tn >= n:
        return n          # single block; block dims equal to array dims are legal
    return tn


def _optlik_kernel(vt_ref, x_ref, xf_ref, L_ref, g_ref, *, sigma, log_const, d_dim):
    # vt_ref: [2, TN]   x_ref / xf_ref: [TN, D]   L_ref: [1, TN]   g_ref: [2, TN]
    diff = x_ref[...] - xf_ref[...]                                # [TN, D]
    sq = diff * diff                                               # [TN, D]

    # Reduce over D *and* transpose to lane-dense in one MXU op:
    #   csq[k, n] = sum_d ones[k, d] * sq[n, d]
    ones = jnp.ones((8, d_dim), jnp.float32)
    csq = jax.lax.dot_general(
        ones, sq,
        dimension_numbers=(((1,), (1,)), ((), ())),
        preferred_element_type=jnp.float32,
        precision=jax.lax.Precision.HIGHEST)                       # [8, TN]
    c = jnp.sqrt(csq[0:1, :])                                      # [1, TN]

    v0 = vt_ref[0:1, :]                                            # [1, TN]
    v1 = vt_ref[1:2, :]                                            # [1, TN]
    d = v1 + sigma
    r = c - v0

    inv_d = pl.reciprocal(d, approx=False)                         # one recip
    inv_d2 = inv_d * inv_d
    rr = r * r

    L_ref[...] = jnp.log(d) + 0.5 * rr * inv_d2 + log_const        # lane-dense store
    g_ref[0:1, :] = -r * inv_d2                                    # dL/dv0
    g_ref[1:2, :] = inv_d - rr * inv_d2 * inv_d                    # dL/dv1


def optimistic_likelihood_forward(v, x, x_feas, *, sigma, x_dim):
    """Pallas implementation of OptimisticLikelihood.forward.

    v:      [N, 2] float32
    x:      [N, D] float32
    x_feas: [N, D] float32
    returns (L [N], v_grad [N, 2])
    """
    N, D = x.shape
    sigma = float(sigma)
    log_const = (float(x_dim) - 1.0) * math.log(sigma)

    x = x.astype(jnp.float32)
    x_feas = x_feas.astype(jnp.float32)
    vT = jnp.transpose(v.astype(jnp.float32))          # (2, N): tiny layout fix

    TN = _pick_tile_n(N, D)
    G = pl.cdiv(N, TN)
    N_pad = G * TN                                      # outputs allocated padded

    # Explicit VMEM budget: x/x_feas double-buffers + small bufs + temporaries.
    blk = TN * D * 4
    vmem_need = (2 * 2 * blk            # x, x_feas double-buffered
                 + 2 * 2 * TN * 4       # vT blocks
                 + 2 * 3 * TN * 4       # L + g output blocks
                 + 3 * blk              # diff/sq/matmul temporaries
                 + (2 << 20))
    vmem_limit = int(min(max(vmem_need, 24 << 20), 48 << 20))

    kernel = functools.partial(
        _optlik_kernel, sigma=sigma, log_const=log_const, d_dim=D)

    L2d, gT = pl.pallas_call(
        kernel,
        out_shape=(
            jax.ShapeDtypeStruct((1, N_pad), jnp.float32),
            jax.ShapeDtypeStruct((2, N_pad), jnp.float32),
        ),
        grid=(G,),
        in_specs=[
            pl.BlockSpec((2, TN), lambda i: (0, i)),    # vT
            pl.BlockSpec((TN, D), lambda i: (i, 0)),    # x    (ragged last block ok)
            pl.BlockSpec((TN, D), lambda i: (i, 0)),    # x_feas
        ],
        out_specs=(
            pl.BlockSpec((1, TN), lambda i: (0, i)),    # L  (lane-dense)
            pl.BlockSpec((2, TN), lambda i: (0, i)),    # g  (lane-dense)
        ),
        compiler_params=pltpu.CompilerParams(
            dimension_semantics=("parallel",),
            vmem_limit_bytes=vmem_limit),
        cost_estimate=pl.CostEstimate(
            flops=int(6 * N * D + 24 * N),
            transcendentals=int(3 * N),
            bytes_accessed=int((2 * N * D + 5 * N) * 4)),
    )(vT, x, x_feas)

    L = L2d[0, :N]
    v_grad = jnp.transpose(gT[:, :N])                   # (2, N) -> (N, 2): tiny
    return L, v_grad


def _reference_forward(v, x, x_feas, *, sigma, x_dim):
    c = jnp.linalg.norm(x - x_feas, axis=-1)
    d = v[..., 1] + sigma
    L = jnp.log(d) + (c - v[..., 0]) ** 2 / (2 * d ** 2) + (x_dim - 1) * jnp.log(sigma)
    g0 = -(c - v[..., 0]) / d ** 2
    g1 = 1 / d - (c - v[..., 0]) ** 2 / d ** 3
    return L, jnp.stack([g0, g1], axis=-1)


if __name__ == "__main__":
    key = jax.random.PRNGKey(0)
    # Small but non-trivial: exercises multiple grid steps and a ragged last block.
    N, D = 300, 32

    # deterministic "module parameters"
    sigma = 0.5       # self.sigma
    x_dim = float(D)  # self.x_dim (p)

    k1, k2, k3 = jax.random.split(key, 3)
    x = jax.random.normal(k1, (N, D), dtype=jnp.float32)
    x_feas = jax.random.normal(k2, (N, D), dtype=jnp.float32)
    # v like optimize() would produce (non-negative, modest magnitude): d > sigma.
    v = jnp.abs(jax.random.normal(k3, (N, 2), dtype=jnp.float32)) * 0.1

    L, v_grad = optimistic_likelihood_forward(v, x, x_feas, sigma=sigma, x_dim=x_dim)
    jax.block_until_ready((L, v_grad))

    L_ref, g_ref = _reference_forward(v, x, x_feas, sigma=sigma, x_dim=x_dim)
    assert L.shape == (N,) and v_grad.shape == (N, 2)
    assert jnp.allclose(L, L_ref, rtol=2e-5, atol=2e-5), "L mismatch"
    assert jnp.allclose(v_grad, g_ref, rtol=2e-5, atol=2e-5), "v_grad mismatch"

    print("KERNEL_OK")
</pallas_src>

<mosaic_0001>
module attributes {stable_mosaic.version = 11 : i64} {
  func.func @_optlik_kernel(%arg0: i32, %arg1: memref<2x128xf32, #tpu.memory_space<vmem>>, %arg2: memref<128x32xf32, #tpu.memory_space<vmem>>, %arg3: memref<128x32xf32, #tpu.memory_space<vmem>>, %arg4: memref<1x128xf32, #tpu.memory_space<vmem>>, %arg5: memref<2x128xf32, #tpu.memory_space<vmem>>) attributes {dimension_semantics = [#tpu.dimension_semantics<parallel>], iteration_bounds = array<i64: 3>, scalar_prefetch = 0 : i64, scratch_operands = 0 : i64, tpu.core_type = #tpu.core_type<tc>, window_params = [{transform_indices = @transform_0, window_bounds = array<i64: 2, 128>}, {transform_indices = @transform_1, window_bounds = array<i64: 128, 32>}, {transform_indices = @transform_2, window_bounds = array<i64: 128, 32>}, {transform_indices = @transform_3, window_bounds = array<i64: 1, 128>}, {transform_indices = @transform_4, window_bounds = array<i64: 2, 128>}]} {
    %c0 = arith.constant 0 : index
    %c0_0 = arith.constant 0 : index
    %0 = vector.load %arg2[%c0, %c0_0] : memref<128x32xf32, #tpu.memory_space<vmem>>, vector<128x32xf32>
    %c0_1 = arith.constant 0 : index
    %c0_2 = arith.constant 0 : index
    %1 = vector.load %arg3[%c0_1, %c0_2] : memref<128x32xf32, #tpu.memory_space<vmem>>, vector<128x32xf32>
    %2 = arith.subf %0, %1 : vector<128x32xf32>
    %3 = arith.mulf %2, %2 : vector<128x32xf32>
    %cst = arith.constant 1.000000e+00 : f32
    %4 = vector.broadcast %cst : f32 to vector<8x32xf32>
    %cst_3 = arith.constant dense<0.000000e+00> : vector<8x128xf32>
    %5 = tpu.matmul %4, %3, %cst_3 {dimension_numbers = #tpu.dot_dimension_numbers<[1], [1], [0], [0], [0, 0, 1, 0], [], []>, precision = #tpu.contract_precision<fp32>} : vector<8x32xf32>, vector<128x32xf32>, vector<8x128xf32> -> vector<8x128xf32>
    %6 = vector.extract_strided_slice %5 {offsets = [0, 0], sizes = [1, 128], strides = [1, 1]} : vector<8x128xf32> to vector<1x128xf32>
    %7 = math.sqrt %6 : vector<1x128xf32>
    %c0_4 = arith.constant 0 : index
    %c0_5 = arith.constant 0 : index
    %8 = vector.load %arg1[%c0_4, %c0_5] : memref<2x128xf32, #tpu.memory_space<vmem>>, vector<1x128xf32>
    %c1 = arith.constant 1 : index
    %c0_6 = arith.constant 0 : index
    %9 = vector.load %arg1[%c1, %c0_6] : memref<2x128xf32, #tpu.memory_space<vmem>>, vector<1x128xf32>
    %cst_7 = arith.constant 5.000000e-01 : f32
    %10 = vector.broadcast %cst_7 : f32 to vector<1x128xf32>
    %11 = arith.addf %9, %10 : vector<1x128xf32>
    %12 = arith.subf %7, %8 : vector<1x128xf32>
    %13 = tpu.reciprocal %11 : vector<1x128xf32> -> vector<1x128xf32>
    %14 = arith.mulf %13, %13 : vector<1x128xf32>
    %15 = arith.mulf %12, %12 : vector<1x128xf32>
    %16 = math.log %11 : vector<1x128xf32>
    %cst_8 = arith.constant 5.000000e-01 : f32
    %17 = vector.broadcast %cst_8 : f32 to vector<1x128xf32>
    %18 = arith.mulf %17, %15 : vector<1x128xf32>
    %19 = arith.mulf %18, %14 : vector<1x128xf32>
    %20 = arith.addf %16, %19 : vector<1x128xf32>
    %cst_9 = arith.constant -21.4875622 : f32
    %21 = vector.broadcast %cst_9 : f32 to vector<1x128xf32>
    %22 = arith.addf %20, %21 : vector<1x128xf32>
    %c0_10 = arith.constant 0 : index
    %c0_11 = arith.constant 0 : index
    %23 = vector.load %arg4[%c0_10, %c0_11] : memref<1x128xf32, #tpu.memory_space<vmem>>, vector<1x128xf32>
    tpu.vector_store %arg4[%c0_10, %c0_11], %22 {strides = array<i32>} : memref<1x128xf32, #tpu.memory_space<vmem>>, vector<1x128xf32>,
    %cst_12 = arith.constant 0.000000e+00 : f32
    %24 = vector.broadcast %cst_12 : f32 to vector<1x128xf32>
    %25 = arith.subf %24, %12 : vector<1x128xf32>
    %26 = arith.mulf %25, %14 : vector<1x128xf32>
    %c0_13 = arith.constant 0 : index
    %c0_14 = arith.constant 0 : index
    %27 = vector.load %arg5[%c0_13, %c0_14] : memref<2x128xf32, #tpu.memory_space<vmem>>, vector<1x128xf32>
    tpu.vector_store %arg5[%c0_13, %c0_14], %26 {strides = array<i32>} : memref<2x128xf32, #tpu.memory_space<vmem>>, vector<1x128xf32>,
    %28 = arith.mulf %15, %14 : vector<1x128xf32>
    %29 = arith.mulf %28, %13 : vector<1x128xf32>
    %30 = arith.subf %13, %29 : vector<1x128xf32>
    %c1_15 = arith.constant 1 : index
    %c0_16 = arith.constant 0 : index
    %31 = vector.load %arg5[%c1_15, %c0_16] : memref<2x128xf32, #tpu.memory_space<vmem>>, vector<1x128xf32>
    tpu.vector_store %arg5[%c1_15, %c0_16], %30 {strides = array<i32>} : memref<2x128xf32, #tpu.memory_space<vmem>>, vector<1x128xf32>,
    return
  }
  func.func @transform_0(%arg0: i32) -> (i32, i32) {
    %c0_i32 = arith.constant 0 : i32
    %c0_i32_0 = arith.constant 0 : i32
    return %c0_i32, %arg0 : i32, i32
  }
  func.func @transform_1(%arg0: i32) -> (i32, i32) {
    %c0_i32 = arith.constant 0 : i32
    %c0_i32_0 = arith.constant 0 : i32
    return %arg0, %c0_i32 : i32, i32
  }
  func.func @transform_2(%arg0: i32) -> (i32, i32) {
    %c0_i32 = arith.constant 0 : i32
    %c0_i32_0 = arith.constant 0 : i32
    return %arg0, %c0_i32 : i32, i32
  }
  func.func @transform_3(%arg0: i32) -> (i32, i32) {
    %c0_i32 = arith.constant 0 : i32
    %c0_i32_0 = arith.constant 0 : i32
    return %c0_i32, %arg0 : i32, i32
  }
  func.func @transform_4(%arg0: i32) -> (i32, i32) {
    %c0_i32 = arith.constant 0 : i32
    %c0_i32_0 = arith.constant 0 : i32
    return %c0_i32, %arg0 : i32, i32
  }
}

</mosaic_0001>

<bundles_post_ra>
// kernel: tpu_custom_call.1
= control target key start
LH: loop header
LB: loop body
LE: loop exit
PB: predicated region body
PF: predicated region fallthrough
CT: control target
= control target key end

     0   :  { %10 = vsyncpa [#allocation3], 0  ;;  %s2285_s0 = inlined_call_operand.vmem [shape: f32[2,300], index: 0, kind: input, shape index: {}]   ;;  %s2286_s1 = inlined_call_operand.vmem [shape: f32[300,32], index: 1, kind: input, shape index: {}]   ;;  %s2287_s2 = inlined_call_operand.vmem [shape: f32[300,32], index: 2, kind: input, shape index: {}]   ;;  %s2288_s3 = inlined_call_operand.hbm [shape: f32[1,384], index: 3, kind: output, shape index: {0}]   ;;  %s2289_s4 = inlined_call_operand.hbm [shape: f32[2,384], index: 4, kind: output, shape index: {1}]  }
   0x1   :  { %12 = vsyncpa [#allocation3 + $0x1], 0 }
   0x2   :  { %13 = vsyncpa [#allocation5], 0 }
   0x3   :  { %15 = vsyncpa [#allocation5 + $0x1], 0  ;;  %s1721_s15 = smov 0   ;;  %s1723_s16 = smov 0  }
   0x4   :  { %s1725_s17 = smov 0   ;;  %s1727_s18 = smov 0  }
   0x5 LB: > { %s1742_s19 = sadd.s32 4294967295, %s1688_s18   ;;  %s1214_s20 = sadd.s32 4294967294, %s1688_s18   ;;  %s1688_s18 = sphi %s1727_s18, %s2295_s18   ;;  %s1684_s17 = sphi %s1725_s17, %s2294_s17   ;;  %s1680_s16 = sphi %s1723_s16, %s2293_s16   ;;  %s1676_s15 = sphi %s1721_s15, %s2292_s15  }
   0x6   : > { %s1746_s21 = sadd.s32 1, %s1688_s18   ;;  %s106_s22 = sadd.s32 1, %s1684_s17 }
   0x7   : > { %s103_s23 = ssub.s32 %s1688_s18, %s1746_s21  ;;  %p116_p0 = scmp.ne.s32.totalorder %s1684_s17, %s1680_s16 }
   0x8   : > { %p104_p1 = scmp.eq.s32.totalorder %s103_s23, 0  ;;  %p117_p2 = scmp.eq.s32.totalorder %s1742_s19, 2 }
   0x9   : > { %p122_p3 = scmp.ne.s32.totalorder %s1680_s16, %s1676_s15  ;;  %p123_p4 = scmp.eq.s32.totalorder %s1214_s20, 2 }
   0xa   : > { %s1757_s24 = scalar_select %p104_p1, %s1684_s17, %s106_s22  }
   0xb   : > { %p1759_p5 = por %p117_p2, %p116_p0  ;;  %p1763_p6 = por %p123_p4, %p122_p3 }
   0xc   : > { %p1217_p7 = scmp.ge.s32.totalorder %s1688_s18, 1  ;;  %p208_p8 = scmp.lt.s32.totalorder %s1688_s18, 4 }
   0xe   : > { %p209_p9 = pnand %p1217_p7, %p208_p8 }
   0xf   : > { %s1770_s27 = sshll.u32 (!%p209_p9), %s1742_s19, 4  ;;  %p255_p11 = scmp.lt.s32.totalorder (!%p209_p9), %s1742_s19, 2 }
  0x10   : > { %212 = sbr.rel (%p209_p9) target bundleno = 491 (0x1eb), region = 32  ;;  %p264_p10 = scmp.lt.s32.totalorder (!%p209_p9), %s1770_s27, 37 }
  0x11   : > { %s2202_s20 = sand.u32 (!%p209_p9), 1, %s1680_s16   ;;  %s1229_s23 = sshll.u32 (!%p209_p9), %s1742_s19, 5 }
  0x12   : > { %s1218_s22 = sshll.u32 (!%p209_p9), %s2202_s20, 1  ;;  %s247_s30 = scalar_lea.vmem (!%p209_p9), [#allocation2], %s2202_s20 }
  0x13   : > { %s1090_s5 = sshll.u32 (!%p209_p9), %s247_s30, 4  ;;  %s2212_s8 = scalar_lea.hbm (!%p209_p9), %s2289_s4, %s1229_s23  ;;  %s2222_s5 = int_to_ptr.vmem [resolvable:$true] %s1090_s5 }
  0x14   : > { %s1694_s13 = smov (!%p209_p9), [#allocation4]  }
  0x15   : > { %v1690_v0 = vmov 0.0   ;;  %vm1691_vm0 = vmmov 0   ;;  %s265_s28 = scalar_select %p264_p10, %s1770_s27, 37  ;;  %vm351_vm1 = vcmask 261120  }
  0x16   : > { %1334 = vmatprep.subr.mxu0 %v1690_v0  ;;  %1369 = vmatprep.subr.mxu1 %v1690_v0  ;;  %s256_s10 = scalar_select %p255_p11, %s1742_s19, 2 }
  0x17   : > { %1366 = vmatprep.mubr.msk.f32.mxu0 %vm1691_vm0, %v1690_v0  ;;  %1401 = vmatprep.mubr.msk.f32.mxu1 %vm1691_vm0, %v1690_v0  ;;  %s1221_s29 = sshll.u32 %s265_s28, 3  ;;  %s254_s28 = scalar_lea.vmem [#allocation4], %s1218_s22 }
  0x18   : > { %s1783_s6 = scalar_lea.vmem %s2286_s1, %s1221_s29  ;;  %s1788_s9 = scalar_lea.vmem %s2287_s2, %s1221_s29 }
  0x19   : > { %v302_v1 = vld [vmem:[%s1783_s6 + $0x78] sm:$0xff]  ;;  %v301_v3 = vld [vmem:[%s1783_s6 + $0x70] sm:$0xff]  ;;  %v300_v6 = vld [vmem:[%s1783_s6 + $0x68] sm:$0xff]  ;;  %s1219_s11 = sshll.u32 %s256_s10, 1  ;;  %s1103_s29 = sshll.u32 %s254_s28, 4  ;;  %s2214_s29 = int_to_ptr.vmem [resolvable:$true] %s1103_s29 }
  0x1a   : > { %v318_v2 = vld [vmem:[%s1788_s9 + $0x78] sm:$0xff]  ;;  %v317_v5 = vld [vmem:[%s1788_s9 + $0x70] sm:$0xff]  ;;  %v316_v7 = vld [vmem:[%s1788_s9 + $0x68] sm:$0xff]  ;;  %s258_s14 = scalar_lea.vmem %s2285_s0, %s1219_s11  ;;  %s2220_s10 = scalar_lea.hbm %s2288_s3, %s1770_s27 }
  0x1b   : > { %v334_v4 = vsub.f32 %v302_v1, %v318_v2  ;;  %v333_v8 = vsub.f32 %v301_v3, %v317_v5  ;;  %v332_v9 = vsub.f32 %v300_v6, %v316_v7  ;;  %v299_v10 = vld [vmem:[%s1783_s6 + $0x60] sm:$0xff]  ;;  %v298_v12 = vld [vmem:[%s1783_s6 + $0x58] sm:$0xff]  ;;  %v297_v16 = vld [vmem:[%s1783_s6 + $0x50] sm:$0xff]  ;;  %s1077_s11 = scalar_lea.sflag [#allocation5], %s2202_s20  ;;  %s1598_s12 = scalar_lea.vmem %s2214_s29, 32 }
  0x1c   : > { %v315_v11 = vld [vmem:[%s1788_s9 + $0x60] sm:$0xff]  ;;  %v314_v15 = vld [vmem:[%s1788_s9 + $0x58] sm:$0xff]  ;;  %v313_v17 = vld [vmem:[%s1788_s9 + $0x50] sm:$0xff]  ;;  %p1599_p12 = scmp.ne.s32.totalorder %s2214_s29, %s1598_s12 }
  0x1d   : > { %v350_v13 = vmul.f32 %v334_v4, %v334_v4  ;;  %v331_v14 = vsub.f32 %v299_v10, %v315_v11  ;;  %v349_v18 = vmul.f32 %v333_v8, %v333_v8  ;;  %v348_v19 = vmul.f32 %v332_v9, %v332_v9  ;;  %v296_v28 = vld [vmem:[%s1783_s6 + $0x48] sm:$0xff]  ;;  %v295_v41 = vld [vmem:[%s1783_s6 + $0x40] sm:$0xff]  ;;  %v294_v52 = vld [vmem:[%s1783_s6 + $0x38] sm:$0xff] }
  0x1e   : > { %v330_v20 = vsub.f32 %v298_v12, %v314_v15  ;;  %v329_v21 = vsub.f32 %v297_v16, %v313_v17  ;;  %v312_v29 = vld [vmem:[%s1788_s9 + $0x48] sm:$0xff]  ;;  %v311_v42 = vld [vmem:[%s1788_s9 + $0x40] sm:$0xff]  ;;  %v310_v53 = vld [vmem:[%s1788_s9 + $0x38] sm:$0xff]  ;;  %p1600_p13 = pnand %p1599_p12, %p1759_p5 }
  0x1f   : > { %v401_v22 = vsel %vm351_vm1, %v350_v13, 0  ;;  %v347_v23 = vmul.f32 %v331_v14, %v331_v14  ;;  %v398_v25 = vsel %vm351_vm1, %v349_v18, 0  ;;  %v395_v26 = vsel %vm351_vm1, %v348_v19, 0  ;;  %v293_v63 = vld [vmem:[%s1783_s6 + $0x30] sm:$0xff]  ;;  %v292_v10 = vld [vmem:[%s1783_s6 + $0x28] sm:$0xff] }
  0x20   : > { %v1803_v24 = vand.u32 4294901760, %v401_v22  ;;  %v346_v27 = vmul.f32 %v330_v20, %v330_v20  ;;  %v1809_v30 = vand.u32 4294901760, %v398_v25  ;;  %v1811_v31 = vand.u32 4294901760, %v395_v26  ;;  %v309_v1 = vld [vmem:[%s1788_s9 + $0x30] sm:$0xff]  ;;  %v308_v11 = vld [vmem:[%s1788_s9 + $0x28] sm:$0xff]  ;;  %v291_v20 = vld [vmem:[%s1783_s6 + $0x20] sm:$0xff]  ;;  %p1601_p0 = pneg %p1600_p13 }
  0x21   : > { %v392_v32 = vsel %vm351_vm1, %v347_v23, 0  ;;  %v345_v36 = vmul.f32 %v329_v21, %v329_v21  ;;  %v328_v39 = vsub.f32 %v296_v28, %v312_v29  ;;  %v327_v51 = vsub.f32 %v295_v41, %v311_v42  ;;  %v307_v21 = vld [vmem:[%s1788_s9 + $0x20] sm:$0xff]  ;;  %v290_v28 = vld [vmem:[%s1783_s6 + $0x18] sm:$0xff] }
  0x22   : > { %1335 = vmatpush3.xpose.msra.mxu0 %v1803_v24  ;;  %v1816_v33 = vsub.f32 %v401_v22, %v1803_v24  ;;  %v1818_v34 = vand.u32 4294901760, %v392_v32  ;;  %v389_v35 = vsel %vm351_vm1, %v346_v27, 0  ;;  %v1823_v37 = vsub.f32 %v398_v25, %v1809_v30  ;;  %v306_v29 = vld [vmem:[%s1788_s9 + $0x18] sm:$0xff] }
  0x23   : > { %1336 = vmatprep.subr.mxu0 %v1690_v0  ;;  %v1826_v38 = vsub.f32 %v395_v26, %v1811_v31  ;;  %v1832_v44 = vand.u32 4294901760, %v389_v35  ;;  %v386_v47 = vsel %vm351_vm1, %v345_v36, 0  ;;  %v344_v50 = vmul.f32 %v328_v39, %v328_v39 }
  0x24   : > { %v497_v40 = vand.u32 4294901760, %v1816_v33  ;;  %v504_v43 = vand.u32 4294901760, %v1823_v37  ;;  %v1841_v48 = vsub.f32 %v392_v32, %v1818_v34  ;;  %v1849_v55 = vand.u32 4294901760, %v386_v47 }
  0x25   : > { %v511_v46 = vand.u32 4294901760, %v1826_v38  ;;  %v1852_v56 = vsub.f32 %v389_v35, %v1832_v44  ;;  %v326_v60 = vsub.f32 %v294_v52, %v310_v53  ;;  %v383_v61 = vsel %vm351_vm1, %v344_v50, 0  ;;  %v289_v52 = vld [vmem:[%s1783_s6 + $0x10] sm:$0xff] }
  0x26   : > { %1337 = vmatpush3.xpose.msra.mxu0 %v1809_v30  ;;  %v498_v45 = vsub.f32 %v1816_v33, %v497_v40  ;;  %v505_v49 = vsub.f32 %v1823_v37, %v504_v43  ;;  %v518_v59 = vand.u32 4294901760, %v1841_v48  ;;  %v343_v62 = vmul.f32 %v327_v51, %v327_v51  ;;  %v305_v53 = vld [vmem:[%s1788_s9 + $0x10] sm:$0xff] }
  0x27   : > { %1338 = vmatprep.subr.mxu0 %v1690_v0  ;;  %v512_v58 = vsub.f32 %v1826_v38, %v511_v46  ;;  %v525_v2 = vand.u32 4294901760, %v1852_v56  ;;  %v1866_v3 = vsub.f32 %v386_v47, %v1849_v55  ;;  %v1872_v6 = vand.u32 4294901760, %v383_v61 }
  0x28   : > { %v499_v54 = vand.u32 4294901760, %v498_v45  ;;  %v506_v57 = vand.u32 4294901760, %v505_v49  ;;  %v519_v5 = vsub.f32 %v1841_v48, %v518_v59  ;;  %v342_v7 = vmul.f32 %v326_v60, %v326_v60 }
  0x29   : > { %v513_v4 = vand.u32 4294901760, %v512_v58  ;;  %v380_v8 = vsel %vm351_vm1, %v343_v62, 0  ;;  %v325_v9 = vsub.f32 %v293_v63, %v309_v1  ;;  %v526_v12 = vsub.f32 %v1852_v56, %v525_v2 }
  0x2a   : > { %1339 = vmatpush3.xpose.msra.mxu0 %v1811_v31  ;;  %1370 = vmatpush3.xpose.msra.mxu1 %v499_v54  ;;  %v532_v13 = vand.u32 4294901760, %v1866_v3  ;;  %v520_v14 = vand.u32 4294901760, %v519_v5  ;;  %v1884_v15 = vand.u32 4294901760, %v380_v8  ;;  %v377_v16 = vsel %vm351_vm1, %v342_v7, 0  ;;  %v304_v5 = vld [vmem:[%s1788_s9 + $0x8] sm:$0xff] }
  0x2b   : > { %1340 = vmatprep.subr.mxu0 %v1690_v0  ;;  %1371 = vmatprep.subr.mxu1 %v1690_v0  ;;  %v1888_v17 = vsub.f32 %v383_v61, %v1872_v6  ;;  %v341_v18 = vmul.f32 %v325_v9, %v325_v9  ;;  %v324_v19 = vsub.f32 %v292_v10, %v308_v11  ;;  %v1894_v22 = vand.u32 4294901760, %v377_v16 }
  0x2c   : > { %v527_v23 = vand.u32 4294901760, %v526_v12  ;;  %v533_v25 = vsub.f32 %v1866_v3, %v532_v13  ;;  %v1902_v27 = vsub.f32 %v380_v8, %v1884_v15  ;;  %v323_v36 = vsub.f32 %v291_v20, %v307_v21 }
  0x2d   : > { %v539_v26 = vand.u32 4294901760, %v1888_v17  ;;  %v374_v32 = vsel %vm351_vm1, %v341_v18, 0  ;;  %v340_v35 = vmul.f32 %v324_v19, %v324_v19  ;;  %v1910_v39 = vsub.f32 %v377_v16, %v1894_v22  ;;  %v287_v18 = vld [vmem:[%s1783_s6] sm:$0xff] }
  0x2e   : > { %1341 = vmatpush3.xpose.msra.mxu0 %v1818_v34  ;;  %1372 = vmatpush3.xpose.msra.mxu1 %v506_v57  ;;  %v322_v41 = vsub.f32 %v290_v28, %v306_v29  ;;  %v534_v42 = vand.u32 4294901760, %v533_v25  ;;  %v1916_v47 = vand.u32 4294901760, %v374_v32  ;;  %v546_v49 = vand.u32 4294901760, %v1902_v27  ;;  %v303_v19 = vld [vmem:[%s1788_s9] sm:$0xff] }
  0x2f   : > { %1342 = vmatprep.subr.mxu0 %v1690_v0  ;;  %1373 = vmatprep.subr.mxu1 %v1690_v0  ;;  %v540_v45 = vsub.f32 %v1888_v17, %v539_v26  ;;  %v371_v50 = vsel %vm351_vm1, %v340_v35, 0  ;;  %v339_v51 = vmul.f32 %v323_v36, %v323_v36  ;;  %v553_v54 = vand.u32 4294901760, %v1910_v39 }
  0x30   : > { %v338_v57 = vmul.f32 %v322_v41, %v322_v41  ;;  %v547_v60 = vsub.f32 %v1902_v27, %v546_v49  ;;  %v1929_v61 = vand.u32 4294901760, %v371_v50  ;;  %v1932_v62 = vsub.f32 %v374_v32, %v1916_v47 }
  0x31   : > { %v541_v58 = vand.u32 4294901760, %v540_v45  ;;  %v368_v63 = vsel %vm351_vm1, %v339_v51, 0  ;;  %v321_v1 = vsub.f32 %v289_v52, %v305_v53  ;;  %v554_v7 = vsub.f32 %v1910_v39, %v553_v54 }
  0x32   : > { %1343 = vmatpush3.xpose.msra.mxu0 %v1832_v44  ;;  %1374 = vmatpush3.xpose.msra.mxu1 %v513_v4  ;;  %v288_v4 = vld [vmem:[%s1783_s6 + $0x8] sm:$0xff]  ;;  %v365_v8 = vsel %vm351_vm1, %v338_v57, 0  ;;  %v548_v9 = vand.u32 4294901760, %v547_v60  ;;  %v1944_v10 = vand.u32 4294901760, %v368_v63  ;;  %v560_v11 = vand.u32 4294901760, %v1932_v62 }
  0x33   : > { %1344 = vmatprep.subr.mxu0 %v1690_v0  ;;  %1375 = vmatprep.subr.mxu1 %v1690_v0  ;;  %v1948_v12 = vsub.f32 %v371_v50, %v1929_v61  ;;  %v320_v16 = vsub.f32 %v288_v4, %v304_v5  ;;  %v1954_v20 = vand.u32 4294901760, %v365_v8  ;;  %v555_v21 = vand.u32 4294901760, %v554_v7 }
  0x34   : > { %v1962_v28 = vsub.f32 %v368_v63, %v1944_v10  ;;  %v319_v35 = vsub.f32 %v287_v18, %v303_v19  ;;  %v1692_v57 = vmov 0  }
  0x35   : > { %v567_v25 = vand.u32 4294901760, %v1948_v12  ;;  %v336_v32 = vmul.f32 %v320_v16, %v320_v16  ;;  %v1968_v36 = vsub.f32 %v365_v8, %v1954_v20 }
  0x36   : > { %1345 = vmatpush3.xpose.msra.mxu0 %v1849_v55  ;;  %1376 = vmatpush3.xpose.msra.mxu1 %v520_v14  ;;  %v337_v14 = vmul.f32 %v321_v1, %v321_v1  ;;  %v574_v50 = vand.u32 4294901760, %v1962_v28  ;;  %v335_v52 = vmul.f32 %v319_v35, %v319_v35 }
  0x37   : > { %1346 = vmatprep.subr.mxu0 %v1690_v0  ;;  %1377 = vmatprep.subr.mxu1 %v1690_v0  ;;  %v359_v51 = vsel %vm351_vm1, %v336_v32, 0  ;;  %v581_v53 = vand.u32 4294901760, %v1968_v36 }
  0x38   : > { %v362_v29 = vsel %vm351_vm1, %v337_v14, 0  ;;  %v575_v63 = vsub.f32 %v1962_v28, %v574_v50  ;;  %v1986_v1 = vand.u32 4294901760, %v359_v51  ;;  %v356_v5 = vsel %vm351_vm1, %v335_v52, 0 }
  0x39   : > { %v1974_v45 = vand.u32 4294901760, %v362_v29  ;;  %v582_v7 = vsub.f32 %v1968_v36, %v581_v53  ;;  %v2000_v14 = vand.u32 4294901760, %v356_v5 }
  0x3a   : > { %1347 = vmatpush3.xpose.msra.mxu0 %v1872_v6  ;;  %1378 = vmatpush3.xpose.msra.mxu1 %v527_v23  ;;  %v561_v23 = vsub.f32 %v1932_v62, %v560_v11  ;;  %v2004_v18 = vsub.f32 %v359_v51, %v1986_v1 }
  0x3b   : > { %1348 = vmatprep.subr.mxu0 %v1690_v0  ;;  %1379 = vmatprep.subr.mxu1 %v1690_v0  ;;  %v1989_v4 = vsub.f32 %v362_v29, %v1974_v45  ;;  %v2015_v32 = vsub.f32 %v356_v5, %v2000_v14 }
  0x3c   : > { %v562_v41 = vand.u32 4294901760, %v561_v23  ;;  %v595_v29 = vand.u32 4294901760, %v2004_v18 }
  0x3d   : > { %v588_v16 = vand.u32 4294901760, %v1989_v4  ;;  %v602_v51 = vand.u32 4294901760, %v2015_v32 }
  0x3e   : > { %1349 = vmatpush3.xpose.msra.mxu0 %v1884_v15  ;;  %1380 = vmatpush3.xpose.msra.mxu1 %v534_v42  ;;  %v568_v42 = vsub.f32 %v1948_v12, %v567_v25 }
  0x3f   : > { %1350 = vmatprep.subr.mxu0 %v1690_v0  ;;  %1381 = vmatprep.subr.mxu1 %v1690_v0  ;;  %v589_v23 = vsub.f32 %v1989_v4, %v588_v16 }
  0x40   : > { %v569_v60 = vand.u32 4294901760, %v568_v42  ;;  %v596_v42 = vsub.f32 %v2004_v18, %v595_v29 }
  0x42   : > { %1351 = vmatpush3.xpose.msra.mxu0 %v1894_v22  ;;  %1382 = vmatpush3.xpose.msra.mxu1 %v541_v58  ;;  %v353_v58 = vsel %vm351_vm1, 1.0, %v1692_v57  ;;  %v597_v57 = vand.u32 4294901760, %v596_v42 }
  0x43   : > { %1352 = vmatprep.subr.mxu0 %v1690_v0  ;;  %1383 = vmatprep.subr.mxu1 %v1690_v0  ;;  %v1997_v8 = vsub.f32 %v353_v58, %v353_v58  ;;  %v603_v58 = vsub.f32 %v2015_v32, %v602_v51 }
  0x45   : > { %v486_v19 = vand.u32 4294901760, %v1997_v8 }
  0x46   : > { %1353 = vmatpush3.xpose.msra.mxu0 %v1916_v47  ;;  %1384 = vmatpush3.xpose.msra.mxu1 %v548_v9  ;;  %v576_v9 = vand.u32 4294901760, %v575_v63  ;;  %v1693_v63 = vmov 1.0  }
  0x47   : > { %1354 = vmatprep.subr.mxu0 %v1690_v0  ;;  %1385 = vmatprep.subr.mxu1 %v1690_v0  ;;  %v487_v35 = vsub.f32 %v1997_v8, %v486_v19 }
  0x49   : > { %v488_v52 = vand.u32 4294901760, %v487_v35 }
  0x4a   : > { %1355 = vmatpush3.xpose.msra.mxu0 %v1929_v61  ;;  %1386 = vmatpush3.xpose.msra.mxu1 %v555_v21  ;;  %v583_v21 = vand.u32 4294901760, %v582_v7 }
  0x4b   : > { %1356 = vmatprep.subr.mxu0 %v1690_v0  ;;  %1387 = vmatprep.subr.mxu1 %v1690_v0 }
  0x4e   : > { %1357 = vmatpush3.xpose.msra.mxu0 %v1944_v10  ;;  %1388 = vmatpush3.xpose.msra.mxu1 %v562_v41  ;;  %v590_v41 = vand.u32 4294901760, %v589_v23 }
  0x4f   : > { %1358 = vmatprep.subr.mxu0 %v1690_v0  ;;  %1389 = vmatprep.subr.mxu1 %v1690_v0 }
  0x52   : > { %1359 = vmatpush3.xpose.msra.mxu0 %v1954_v20  ;;  %1390 = vmatpush3.xpose.msra.mxu1 %v569_v60  ;;  %v604_v60 = vand.u32 4294901760, %v603_v58 }
  0x53   : > { %1360 = vmatprep.subr.mxu0 %v1690_v0  ;;  %1391 = vmatprep.subr.mxu1 %v1690_v0 }
  0x56   : > { %1361 = vmatpush3.xpose.msra.mxu0 %v1974_v45  ;;  %1392 = vmatpush3.xpose.msra.mxu1 %v576_v9 }
  0x57   : > { %1362 = vmatprep.subr.mxu0 %v1690_v0  ;;  %1393 = vmatprep.subr.mxu1 %v1690_v0 }
  0x5a   : > { %1363 = vmatpush3.xpose.msra.mxu0 %v1986_v1  ;;  %1394 = vmatpush3.xpose.msra.mxu1 %v583_v21 }
  0x5b   : > { %1364 = vmatprep.subr.mxu0 %v1690_v0  ;;  %1395 = vmatprep.subr.mxu1 %v1690_v0 }
  0x5e   : > { %1365 = vmatpush3.xpose.msra.mxu0 %v2000_v14  ;;  %1396 = vmatpush3.xpose.msra.mxu1 %v590_v41 }
  0x5f   : > { %1397 = vmatprep.subr.mxu1 %v1690_v0  ;;  %1404 = vmatprep.subr.mxu0 %v1690_v0 }
  0x61   : > { %1367 = vmatmul.mubr.f32.vlgmr.msra.gmra.mxu0 %v488_v52 }
  0x62   : > { %1398 = vmatpush3.xpose.msra.mxu1 %v597_v57  ;;  %1405 = vmatpush3.xpose.msra.mxu0 %v1816_v33 }
  0x63   : > { %1399 = vmatprep.subr.mxu1 %v1690_v0  ;;  %1406 = vmatprep.subr.mxu0 %v1690_v0 }
  0x64   : > { %1436 = vmatprep.mubr.msk.f32.mxu0 %vm1691_vm0, %v1690_v0 }
  0x66   : > { %1400 = vmatpush3.xpose.msra.mxu1 %v604_v60  ;;  %1407 = vmatpush3.xpose.msra.mxu0 %v1823_v37 }
  0x67   : > { %1408 = vmatprep.subr.mxu0 %v1690_v0  ;;  %1439 = vmatprep.subr.mxu1 %v1690_v0 }
  0x69   : > { %1402 = vmatmul.mubr.msk.f32.vlgmr.msra.gmra.mxu1 %vm351_vm1, %v1693_v63 }
  0x6a   : > { %1409 = vmatpush3.xpose.msra.mxu0 %v1826_v38  ;;  %1440 = vmatpush3.xpose.msra.mxu1 %v1803_v24 }
  0x6b   : > { %1410 = vmatprep.subr.mxu0 %v1690_v0  ;;  %1441 = vmatprep.subr.mxu1 %v1690_v0 }
  0x6c   : > { %1471 = vmatprep.mubr.msk.f32.mxu1 %vm1691_vm0, %v1690_v0 }
  0x6e   : > { %1411 = vmatpush3.xpose.msra.mxu0 %v1841_v48  ;;  %1442 = vmatpush3.xpose.msra.mxu1 %v1809_v30 }
  0x6f   : > { %1412 = vmatprep.subr.mxu0 %v1690_v0  ;;  %1443 = vmatprep.subr.mxu1 %v1690_v0 }
  0x72   : > { %1413 = vmatpush3.xpose.msra.mxu0 %v1852_v56  ;;  %1444 = vmatpush3.xpose.msra.mxu1 %v1811_v31 }
  0x73   : > { %1414 = vmatprep.subr.mxu0 %v1690_v0  ;;  %1445 = vmatprep.subr.mxu1 %v1690_v0 }
  0x76   : > { %1415 = vmatpush3.xpose.msra.mxu0 %v1866_v3  ;;  %1446 = vmatpush3.xpose.msra.mxu1 %v1818_v34 }
  0x77   : > { %1416 = vmatprep.subr.mxu0 %v1690_v0  ;;  %1447 = vmatprep.subr.mxu1 %v1690_v0 }
  0x7a   : > { %1417 = vmatpush3.xpose.msra.mxu0 %v1888_v17  ;;  %1448 = vmatpush3.xpose.msra.mxu1 %v1832_v44 }
  0x7b   : > { %1418 = vmatprep.subr.mxu0 %v1690_v0  ;;  %1449 = vmatprep.subr.mxu1 %v1690_v0 }
  0x7e   : > { %1419 = vmatpush3.xpose.msra.mxu0 %v1902_v27  ;;  %1450 = vmatpush3.xpose.msra.mxu1 %v1849_v55 }
  0x7f   : > { %1420 = vmatprep.subr.mxu0 %v1690_v0  ;;  %1451 = vmatprep.subr.mxu1 %v1690_v0 }
  0x82   : > { %1421 = vmatpush3.xpose.msra.mxu0 %v1910_v39  ;;  %1452 = vmatpush3.xpose.msra.mxu1 %v1872_v6 }
  0x83   : > { %1422 = vmatprep.subr.mxu0 %v1690_v0  ;;  %1453 = vmatprep.subr.mxu1 %v1690_v0 }
  0x86   : > { %1423 = vmatpush3.xpose.msra.mxu0 %v1932_v62  ;;  %1454 = vmatpush3.xpose.msra.mxu1 %v1884_v15 }
  0x87   : > { %1424 = vmatprep.subr.mxu0 %v1690_v0  ;;  %1455 = vmatprep.subr.mxu1 %v1690_v0 }
  0x8a   : > { %1425 = vmatpush3.xpose.msra.mxu0 %v1948_v12  ;;  %1456 = vmatpush3.xpose.msra.mxu1 %v1894_v22 }
  0x8b   : > { %1426 = vmatprep.subr.mxu0 %v1690_v0  ;;  %1457 = vmatprep.subr.mxu1 %v1690_v0 }
  0x8e   : > { %1427 = vmatpush3.xpose.msra.mxu0 %v1962_v28  ;;  %1458 = vmatpush3.xpose.msra.mxu1 %v1916_v47 }
  0x8f   : > { %1428 = vmatprep.subr.mxu0 %v1690_v0  ;;  %1459 = vmatprep.subr.mxu1 %v1690_v0 }
  0x92   : > { %1429 = vmatpush3.xpose.msra.mxu0 %v1968_v36  ;;  %1460 = vmatpush3.xpose.msra.mxu1 %v1929_v61 }
  0x93   : > { %1430 = vmatprep.subr.mxu0 %v1690_v0  ;;  %1461 = vmatprep.subr.mxu1 %v1690_v0 }
  0x96   : > { %1431 = vmatpush3.xpose.msra.mxu0 %v1989_v4  ;;  %1462 = vmatpush3.xpose.msra.mxu1 %v1944_v10 }
  0x97   : > { %1432 = vmatprep.subr.mxu0 %v1690_v0  ;;  %1463 = vmatprep.subr.mxu1 %v1690_v0 }
  0x9a   : > { %1433 = vmatpush3.xpose.msra.mxu0 %v2004_v18  ;;  %1464 = vmatpush3.xpose.msra.mxu1 %v1954_v20 }
  0x9b   : > { %1434 = vmatprep.subr.mxu0 %v1690_v0  ;;  %1465 = vmatprep.subr.mxu1 %v1690_v0 }
  0x9e   : > { %1435 = vmatpush3.xpose.msra.mxu0 %v2015_v32  ;;  %1466 = vmatpush3.xpose.msra.mxu1 %v1974_v45 }
  0x9f   : > { %1467 = vmatprep.subr.mxu1 %v1690_v0  ;;  %1474 = vmatprep.subr.mxu0 %v1690_v0 }
  0xa1   : > { %1437 = vmatmul.mubr.f32.vlgmr.msra.gmra.mxu0 %v1997_v8 }
  0xa2   : > { %1468 = vmatpush3.xpose.msra.mxu1 %v1986_v1  ;;  %1475 = vmatpush3.xpose.msra.mxu0 %v497_v40 }
  0xa3   : > { %1469 = vmatprep.subr.mxu1 %v1690_v0  ;;  %1476 = vmatprep.subr.mxu0 %v1690_v0 }
  0xa4   : > { %1506 = vmatprep.mubr.msk.f32.mxu0 %vm1691_vm0, %v1690_v0 }
  0xa6   : > { %1470 = vmatpush3.xpose.msra.mxu1 %v2000_v14  ;;  %1477 = vmatpush3.xpose.msra.mxu0 %v504_v43 }
  0xa7   : > { %1478 = vmatprep.subr.mxu0 %v1690_v0  ;;  %1509 = vmatprep.subr.mxu1 %v1690_v0 }
  0xa9   : > { %1472 = vmatmul.mubr.f32.vlgmr.msra.gmra.mxu1 %v486_v19 }
  0xaa   : > { %1479 = vmatpush3.xpose.msra.mxu0 %v511_v46  ;;  %1510 = vmatpush3.xpose.msra.mxu1 %v1803_v24 }
  0xab   : > { %1480 = vmatprep.subr.mxu0 %v1690_v0  ;;  %1511 = vmatprep.subr.mxu1 %v1690_v0 }
  0xac   : > { %1541 = vmatprep.mubr.msk.f32.mxu1 %vm1691_vm0, %v1690_v0 }
  0xae   : > { %1481 = vmatpush3.xpose.msra.mxu0 %v518_v59  ;;  %1512 = vmatpush3.xpose.msra.mxu1 %v1809_v30 }
  0xaf   : > { %1482 = vmatprep.subr.mxu0 %v1690_v0  ;;  %1513 = vmatprep.subr.mxu1 %v1690_v0 }
  0xb2   : > { %1483 = vmatpush3.xpose.msra.mxu0 %v525_v2  ;;  %1514 = vmatpush3.xpose.msra.mxu1 %v1811_v31 }
  0xb3   : > { %1484 = vmatprep.subr.mxu0 %v1690_v0  ;;  %1515 = vmatprep.subr.mxu1 %v1690_v0 }
  0xb6   : > { %1485 = vmatpush3.xpose.msra.mxu0 %v532_v13  ;;  %1516 = vmatpush3.xpose.msra.mxu1 %v1818_v34 }
  0xb7   : > { %1486 = vmatprep.subr.mxu0 %v1690_v0  ;;  %1517 = vmatprep.subr.mxu1 %v1690_v0 }
  0xba   : > { %1487 = vmatpush3.xpose.msra.mxu0 %v539_v26  ;;  %1518 = vmatpush3.xpose.msra.mxu1 %v1832_v44  ;;  %v1051_v26 = vld [vmem:[%s258_s14] sm:$0x1] }
  0xbb   : > { %1488 = vmatprep.subr.mxu0 %v1690_v0  ;;  %1519 = vmatprep.subr.mxu1 %v1690_v0 }
  0xbe   : > { %1489 = vmatpush3.xpose.msra.mxu0 %v546_v49  ;;  %1520 = vmatpush3.xpose.msra.mxu1 %v1849_v55  ;;  %v1052_v55 = vld [vmem:[%s258_s14 + $0x1] sm:$0x1]  ;;  %s1602_s14 = sshll.u32 %s1694_s13, 4  ;;  %s1603_s14 = int_to_ptr.vmem [resolvable:$false] %s1602_s14 }
  0xbf   : > { %1490 = vmatprep.subr.mxu0 %v1690_v0  ;;  %1521 = vmatprep.subr.mxu1 %v1690_v0  ;;  %v1053_v3 = vadd.f32 0.5, %v1052_v55  ;;  %s1604_s22 = scalar_lea.vmem %s1603_s14, 64  ;;  %p1605_p1 = scmp.lt.s32.totalorder %s2214_s29, %s1603_s14 }
  0xc0   : > { %p1606_p2 = scmp.lt.s32.totalorder %s1604_s22, %s1598_s12 }
  0xc2   : > { %1491 = vmatpush3.xpose.msra.mxu0 %v553_v54  ;;  %1522 = vmatpush3.xpose.msra.mxu1 %v1872_v6  ;;  %p1607_p3 = por %p1606_p2, %p1605_p1 }
  0xc3   : > { %1492 = vmatprep.subr.mxu0 %v1690_v0  ;;  %1523 = vmatprep.subr.mxu1 %v1690_v0 }
  0xc4   : > { %p1608_p4 = pnand %p1607_p3, %p1601_p0 }
  0xc6   : > { %1493 = vmatpush3.xpose.msra.mxu0 %v560_v11  ;;  %1524 = vmatpush3.xpose.msra.mxu1 %v1884_v15 }
  0xc7   : > { %1494 = vmatprep.subr.mxu0 %v1690_v0  ;;  %1525 = vmatprep.subr.mxu1 %v1690_v0 }
  0xca   : > { %1495 = vmatpush3.xpose.msra.mxu0 %v567_v25  ;;  %1526 = vmatpush3.xpose.msra.mxu1 %v1894_v22 }
  0xcb   : > { %1496 = vmatprep.subr.mxu0 %v1690_v0  ;;  %1527 = vmatprep.subr.mxu1 %v1690_v0 }
  0xce   : > { %1497 = vmatpush3.xpose.msra.mxu0 %v574_v50  ;;  %1528 = vmatpush3.xpose.msra.mxu1 %v1916_v47 }
  0xcf   : > { %1498 = vmatprep.subr.mxu0 %v1690_v0  ;;  %1529 = vmatprep.subr.mxu1 %v1690_v0 }
  0xd2   : > { %1499 = vmatpush3.xpose.msra.mxu0 %v581_v53  ;;  %1530 = vmatpush3.xpose.msra.mxu1 %v1929_v61 }
  0xd3   : > { %1500 = vmatprep.subr.mxu0 %v1690_v0  ;;  %1531 = vmatprep.subr.mxu1 %v1690_v0 }
  0xd6   : > { %1501 = vmatpush3.xpose.msra.mxu0 %v588_v16  ;;  %1532 = vmatpush3.xpose.msra.mxu1 %v1944_v10 }
  0xd7   : > { %1502 = vmatprep.subr.mxu0 %v1690_v0  ;;  %1533 = vmatprep.subr.mxu1 %v1690_v0 }
  0xda   : > { %1503 = vmatpush3.xpose.msra.mxu0 %v595_v29  ;;  %1534 = vmatpush3.xpose.msra.mxu1 %v1954_v20 }
  0xdb   : > { %1504 = vmatprep.subr.mxu0 %v1690_v0  ;;  %1535 = vmatprep.subr.mxu1 %v1690_v0 }
  0xde   : > { %1505 = vmatpush3.xpose.msra.mxu0 %v602_v51  ;;  %1536 = vmatpush3.xpose.msra.mxu1 %v1974_v45 }
  0xdf   : > { %1537 = vmatprep.subr.mxu1 %v1690_v0 }
  0xe1   : > { %1507 = vmatmul.mubr.msk.f32.vlgmr.msra.gmra.mxu0 %vm351_vm1, %v1693_v63 }
  0xe2   : > { %1538 = vmatpush3.xpose.msra.mxu1 %v1986_v1 }
  0xe3   : > { %1539 = vmatprep.subr.mxu1 %v1690_v0 }
  0xe6   : > { %1540 = vmatpush3.xpose.msra.mxu1 %v2000_v14 }
  0xe9   : > { %1542 = vmatmul.mubr.msk.f32.vlgmr.msra.gmra.mxu1 %vm351_vm1, %v1693_v63 }
 0x121   : > { %v490_v24 = vpop.f32.mrf.mxu0 }
 0x123   : > { %v1368_v30 = vpop.f32.mrf.mxu0 }
 0x129   : > { %v641_v31 = vpop.f32.mrf.mxu1 }
 0x12a   : > { %v642_v33 = vadd.f32 %v641_v31, %v490_v24 }
 0x12b   : > { %v1403_v34 = vpop.f32.mrf.mxu1 }
 0x161   : > { %v745_v37 = vpop.f32.mrf.mxu0 }
 0x162   : > { %v746_v38 = vadd.f32 %v745_v37, %v642_v33 }
 0x163   : > { %v1438_v40 = vpop.f32.mrf.mxu0 }
 0x169   : > { %v834_v43 = vpop.f32.mrf.mxu1 }
 0x16a   : > { %v835_v48 = vadd.f32 %v834_v43, %v746_v38 }
 0x16b   : > { %v1473_v44 = vpop.f32.mrf.mxu1 }
 0x1a1   : > { %v953_v46 = vpop.f32.mrf.mxu0 }
 0x1a2   : > { %v954_v56 = vadd.f32 %v953_v46, %v835_v48 }
 0x1a3   : > { %v1508_v0 = vpop.f32.mrf.mxu0 }
 0x1a9   : > { %v1040_v59 = vpop.f32.mrf.mxu1 }
 0x1aa   : > { %v1041_v2 = vadd.f32 %v1040_v59, %v954_v56 }
 0x1ab   : > { %v1543_v6 = vpop.f32.mrf.mxu1 }
 0x1ac   : > { %1592 = vrsqrt.f32 %v1041_v2  ;;  %vm1046_vm2 = vcmp.eq.f32.partialorder %v1041_v2, inf  ;;  %v1049_v22 = vand.u32 2147483648, %v1041_v2  ;;  %vm1048_vm3 = vcmp.eq.f32.partialorder %v1041_v2, 0.0 }
 0x1ad   : > { %1594 = vrcp.f32 %v1053_v3 }
 0x1ae   : > { %1596 = vlog2.f32 %v1053_v3 }
 0x1b9   : > { %v1593_v13 = vpop.eup %1592 }
 0x1ba   : > { %v1045_v15 = vmul.f32 %v1593_v13, %v1041_v2  ;;  %v1595_v17 = vpop.eup %1594 }
 0x1bb   : > { %v1056_v49 = vmul.f32 %v1595_v17, %v1595_v17  ;;  %v1597_v54 = vpop.eup %1596 }
 0x1bc   : > { %v1047_v27 = vsel %vm1046_vm2, %v1041_v2, %v1045_v15  ;;  %v1059_v10 = vmul.f32 0.6931472, %v1597_v54 }
 0x1bd   : > { %v1050_v39 = vsel %vm1048_vm3, %v1049_v22, %v1047_v27 }
 0x1be   : > { %v1054_v47 = vsub.f32 %v1050_v39, %v1051_v26 }
 0x1c0   : > { %v1057_v61 = vmul.f32 %v1054_v47, %v1054_v47  ;;  %v1065_v62 = vsub.f32 0.0, %v1054_v47 }
 0x1c2   : > { %v1060_v11 = vmul.f32 0.5, %v1057_v61  ;;  %v1066_v12 = vmul.f32 %v1065_v62, %v1056_v49  ;;  %v1068_v20 = vmul.f32 %v1057_v61, %v1056_v49 }
 0x1c4   : > { %v1061_v25 = vmul.f32 %v1060_v11, %v1056_v49  ;;  %1067 = vst [vmem:[%s254_s28] sm:$0x1] %v1066_v12  ;;  %v1069_v28 = vmul.f32 %v1595_v17, %v1068_v20 }
 0x1c6   : > { %v1062_v36 = vadd.f32 %v1061_v25, %v1059_v10  ;;  %v1070_v45 = vsub.f32 %v1595_v17, %v1069_v28 }
 0x1c8   : > { %v1063_v50 = vadd.f32 -21.487562, %v1062_v36  ;;  %1071 = vst [vmem:[%s254_s28 + $0x1] sm:$0x1] %v1070_v45 }
 0x1c9   : > { %1611 = shalt.err (!%p1608_p4)
}
 0x1ca   : > { %s1612_s27 = scalar_lea.hbm %s2212_s8, 32  ;;  %s1616_s6 = scalar_lea.hbm %s2289_s4, 96 }
 0x1cb   : > { %p1613_p7 = scmp.ne.s32.totalorder %s2212_s8, %s1612_s27  ;;  %p1617_p10 = scmp.lt.s32.totalorder %s2212_s8, %s2289_s4 }
 0x1cc   : > { %p1618_p11 = scmp.lt.s32.totalorder %s1616_s6, %s1612_s27 }
 0x1cd   : > { %p1614_p8 = pnand %p1613_p7, %p1759_p5 }
 0x1ce   : > { %p1619_p12 = por %p1618_p11, %p1617_p10 }
 0x1cf   : > { %p1615_p9 = pneg %p1614_p8 }
 0x1d1   : > { %p1620_p13 = pnand %p1619_p12, %p1615_p9 }
 0x1d3   : > { %1623 = shalt.err (!%p1620_p13)
}
 0x1d4   : > { %1545 = dma.vmem_to_hbm [thread:$0]  (%p1759_p5), %s2214_s29, 32, %s2212_s8, %s1077_s11   ;;  %1064 = vst [vmem:[%s247_s30] sm:$0x1] %v1063_v50 }
 0x1d5   : > { %s1073_s9 = scalar_lea.sflag [#allocation3], %s2202_s20  ;;  %s1624_s12 = scalar_lea.vmem %s2222_s5, 16 }
 0x1d6   : > { %p1625_p0 = scmp.ne.s32.totalorder %s2222_s5, %s1624_s12  ;;  %s1695_s13 = smov [#allocation2]  }
 0x1d7   : > { %s1628_s14 = sshll.u32 %s1695_s13, 4  ;;  %s1629_s14 = int_to_ptr.vmem [resolvable:$false] %s1628_s14 }
 0x1d8   : > { %p1626_p1 = pnand %p1625_p0, %p1759_p5  ;;  %s1630_s22 = scalar_lea.vmem %s1629_s14, 32 }
 0x1d9   : > { %p1631_p3 = scmp.lt.s32.totalorder %s2222_s5, %s1629_s14  ;;  %p1632_p4 = scmp.lt.s32.totalorder %s1630_s22, %s1624_s12 }
 0x1da   : > { %p1627_p2 = pneg %p1626_p1 }
 0x1db   : > { %p1633_p7 = por %p1632_p4, %p1631_p3 }
 0x1dd   : > { %p1634_p8 = pnand %p1633_p7, %p1627_p2 }
 0x1df   : > { %1637 = shalt.err (!%p1634_p8)
}
 0x1e0   : > { %s1638_s29 = scalar_lea.hbm %s2220_s10, 16  ;;  %s1642_s8 = scalar_lea.hbm %s2288_s3, 48 }
 0x1e1   : > { %p1639_p9 = scmp.ne.s32.totalorder %s2220_s10, %s1638_s29  ;;  %p1643_p12 = scmp.lt.s32.totalorder %s2220_s10, %s2288_s3 }
 0x1e2   : > { %p1644_p13 = scmp.lt.s32.totalorder %s1642_s8, %s1638_s29 }
 0x1e3   : > { %p1640_p10 = pnand %p1639_p9, %p1759_p5 }
 0x1e4   : > { %p1645_p0 = por %p1644_p13, %p1643_p12 }
 0x1e5   : > { %p1641_p11 = pneg %p1640_p10 }
 0x1e7   : > { %p1646_p1 = pnand %p1645_p0, %p1641_p11 }
 0x1e9   : > { %1649 = shalt.err (!%p1646_p1)
}
 0x1ea   : > { %1544 = dma.vmem_to_hbm [thread:$0]  (%p1759_p5), %s2222_s5, 16, %s2220_s10, %s1073_s9  }
 0x1eb PF: > { %p1555_p2 = scmp.ge.s32.totalorder %s1688_s18, 2  ;;  %s1115_s23 = sand.u32 1, %s1676_s15  }
 0x1ec   : > { %s1116_s28 = scalar_lea.sflag [#allocation3], %s1115_s23 }
 0x1ed   : > { %p1549_p3 = pnand %p1555_p2, %p1763_p6 }
 0x1ef   : > { %p1550_p4 = pneg %p1549_p3 }
 0x1f1   : > { %1667 = dma.done.wait (%p1550_p4), %s1116_s28, 16  }
 0x1f2   : > { %1669 = vsyncadd (%p1550_p4), %s1116_s28, 4294967280  ;;  %s1124_s6 = scalar_lea.sflag [#allocation5], %s1115_s23 }
 0x1f3   : > { %1671 = dma.done.wait (%p1550_p4), %s1124_s6, 32  }
 0x1f4   : > { %1673 = vsyncadd (%p1550_p4), %s1124_s6, 4294967264  ;;  %p18_p5 = scmp.ge.s32.totalorder %s1746_s21, 5   ;;  %s2292_s15 = smov %s1680_s16 }
 0x1f5   : > { %s2293_s16 = smov %s1684_s17  ;;  %s2294_s17 = smov %s1757_s24 }
 0x1f6   : > { %s2295_s18 = smov %s1746_s21  ;;  %20 = sbr.rel (!%p18_p5) target bundleno = 5 (0x5), region = 90 }
 0x1fb   :  { %1129 = vsyncpa [#allocation3], 1 }
 0x1fc   :  { %1131 = vsyncpa [#allocation3 + $0x1], 1 }
 0x1fd   :  { %1132 = vsyncpa [#allocation5], 1 }
 0x1fe   :  { %1134 = vsyncpa [#allocation5 + $0x1], 1 }

</bundles_post_ra>
